<compile_context>
chip_gen: v6e
topology: v6e:2x2x1
jax: 0.10.0
libtpu: 0.0.40
codegen_flags: <defaults>
</compile_context>

<pallas_src>
import functools
import math

import jax
import jax.numpy as jnp
from jax.experimental import pallas as pl
from jax.experimental.pallas import tpu as pltpu

_TARGET_STEP_BYTES = 2 * 1024 * 1024   # amortize ~0.35us per grid step
_RESERVE_BYTES = 16 * 1024 * 1024      # row/out buffers headroom when weight-resident


def _round_up(a: int, b: int) -> int:
    return pl.cdiv(a, b) * b


def _vmem_capacity_bytes() -> int:
    # v5e/v6e: 128 MiB; v7x: 64 MiB per TensorCore.  Conservative fallback = 64 MiB.
    try:
        return int(pltpu.get_tpu_info().vmem_capacity_bytes)
    except Exception:
        return 64 * 1024 * 1024


def _linear_kernel(x_ref, w_ref, b_ref, o_ref, *, compute_dtype):
    # Cast x on the VPU (hidden under the MXU) instead of a separate XLA cast pass.
    x = x_ref[...].astype(compute_dtype)
    acc = jnp.dot(x, w_ref[...], preferred_element_type=jnp.float32)
    o_ref[...] = (acc + b_ref[...]).astype(o_ref.dtype)


def time_distributed_linear(x, weight_t, bias, *, compute_dtype=jnp.bfloat16,
                            out_dtype=None, tm=None, tn=None, batch_first=True):
    """y = x @ weight_t + bias over the last axis of x (time_distributed semantics).

    x:        (..., C_in)    typically (B, T, C_in)
    weight_t: (C_in, C_out)  pre-transposed nn.Linear weight (weight.T), cast it to
                             bf16 once on the caller side for repeated calls.
    bias:     (C_out,)
    compute_dtype: MXU input dtype.  Default bf16 (f32 accumulation + f32 bias add).
                   Keep f32 compute test-only, especially on v5e (bf16-only MXU).
    out_dtype: output dtype.  Defaults to x.dtype (module semantics); pass bf16 to
               halve output HBM traffic when the consumer accepts it.
    """
    orig_shape = x.shape
    C_in = orig_shape[-1]
    assert weight_t.shape[0] == C_in, "weight_t must be (C_in, C_out)"
    C_out = weight_t.shape[1]
    compute_dtype = jnp.dtype(compute_dtype) if compute_dtype is not None else jnp.dtype(x.dtype)
    out_dtype = jnp.dtype(out_dtype) if out_dtype is not None else jnp.dtype(x.dtype)

    # Flatten all leading dims (ndim<=2 matches applying the Linear directly).
    M = int(math.prod(orig_shape[:-1])) if len(orig_shape) > 1 else 1
    M = max(M, 1)

    # Lane-dense output: pad C_out to a multiple of 128 (zero weight/bias columns).
    C_out_pad = _round_up(C_out, 128)

    xb = jnp.dtype(x.dtype).itemsize
    wb = compute_dtype.itemsize
    ob = out_dtype.itemsize

    capacity = _vmem_capacity_bytes()
    budget = int(0.8 * capacity)

    # ---- N (C_out) tiling: weight-resident when it fits, else tile along C_out ------
    w_bytes = C_in * C_out_pad * wb
    if tn is not None:
        tn_eff = min(_round_up(tn, 128), C_out_pad)
        while C_out_pad % tn_eff != 0:
            tn_eff -= 128
    elif w_bytes + _RESERVE_BYTES <= budget:
        tn_eff = C_out_pad                      # fully resident (v5e/v6e common case)
    else:
        tn_eff = 128
        for cand in (1024, 896, 768, 640, 512, 384, 256):
            if C_out_pad % cand == 0 and 2 * C_in * cand * wb + _RESERVE_BYTES <= budget:
                tn_eff = cand
                break
    nj = C_out_pad // tn_eff
    w_bufs = 1 if nj == 1 else 2                 # single-buffer only when index is constant
    w_vmem = (C_in * tn_eff * wb + tn_eff * 4) * w_bufs

    # ---- M (row) tiling: big enough to amortize per-step overhead, VMEM-capped ------
    row_bytes = max(C_in * xb + tn_eff * ob, 1)
    if tm is None:
        tm_eff = _round_up(max(pl.cdiv(_TARGET_STEP_BYTES, row_bytes), 512), 16)
    else:
        tm_eff = _round_up(max(tm, 16), 16)
    per_row_db = 2 * C_in * xb + 2 * tn_eff * ob           # double-buffered x + out rows
    tm_cap_vmem = max(((budget - w_vmem) // per_row_db) // 16 * 16, 16)
    tm_eff = max(min(tm_eff, tm_cap_vmem, 4096), 16)
    if tm_eff >= M:
        tm_eff = M                               # full-dim block: no ragged tile at all
    ni = pl.cdiv(M, tm_eff)

    # ---- wrapper-side glue (reshape / pad columns / cast weight once) ---------------
    x_flat = x.reshape(M, C_in)                  # no M padding, no astype of x
    if C_out_pad != C_out:
        w_p = jnp.pad(weight_t, ((0, 0), (0, C_out_pad - C_out)))
        b_p = jnp.pad(bias, (0, C_out_pad - C_out))
    else:
        w_p, b_p = weight_t, bias
    w_c = w_p if w_p.dtype == compute_dtype else w_p.astype(compute_dtype)
    b2 = b_p.reshape(1, C_out_pad).astype(jnp.float32)

    # ---- VMEM budget + cost hint -----------------------------------------------------
    est = w_vmem + 2 * tm_eff * C_in * xb + 2 * tm_eff * tn_eff * ob + (1 << 20)
    vmem_limit = min(int(0.85 * capacity), max(32 * 1024 * 1024, int(est * 1.25)))

    cost = pl.CostEstimate(
        flops=2 * M * C_in * C_out_pad,
        transcendentals=0,
        bytes_accessed=(nj * M * C_in * xb + C_in * C_out_pad * wb
                        + C_out_pad * 4 + M * C_out_pad * ob),
    )

    kernel = functools.partial(_linear_kernel, compute_dtype=compute_dtype)

    def _call(single_buffer_params: bool):
        wkw = dict(pipeline_mode=pl.Buffered(1)) if single_buffer_params else {}
        grid_spec = pltpu.PrefetchScalarGridSpec(
            num_scalar_prefetch=0,
            grid=(nj, ni),                      # j (C_out tile) outer, i (rows) inner
            in_specs=[
                pl.BlockSpec((tm_eff, C_in), lambda j, i: (i, 0)),
                pl.BlockSpec((C_in, tn_eff), lambda j, i: (0, j), **wkw),
                pl.BlockSpec((1, tn_eff), lambda j, i: (0, j), **wkw),
            ],
            out_specs=pl.BlockSpec((tm_eff, tn_eff), lambda j, i: (i, j)),
        )
        return pl.pallas_call(
            kernel,
            out_shape=jax.ShapeDtypeStruct((M, C_out_pad), out_dtype),
            grid_spec=grid_spec,
            compiler_params=pltpu.CompilerParams(
                # TODO(synk): on v7x, confirm in xprof that the 'parallel' axes shard
                # across both TensorCores; if not, switch to pltpu.CORE_PARALLEL/core_map.
                dimension_semantics=("parallel", "parallel"),
                vmem_limit_bytes=vmem_limit,
            ),
            cost_estimate=cost,
        )(x_flat, w_c, b2)

    if nj == 1:
        # Constant weight/bias block index -> single VMEM buffer (halves resident weight
        # footprint).  Fall back to default double-buffering if Buffered(1) is rejected.
        try:
            y_flat = _call(True)
        except Exception:
            y_flat = _call(False)
    else:
        y_flat = _call(False)

    # Drop lane padding (only when C_out % 128 != 0); no row slicing needed.
    if C_out_pad != C_out:
        y_flat = y_flat[:, :C_out]

    # time_distributed reshape semantics (matches the reference module exactly).
    if len(orig_shape) <= 2:
        return y_flat.reshape(*orig_shape[:-1], C_out)
    if batch_first:
        return y_flat.reshape(orig_shape[0], -1, C_out)
    # NOTE: the reference module uses `view(-1, x_size[0], out)` in BOTH branches, so we
    # intentionally keep orig_shape[0] here (not orig_shape[1]) to match it bit-for-bit.
    return y_flat.reshape(-1, orig_shape[0], C_out)


if __name__ == "__main__":
    key = jax.random.PRNGKey(0)
    kx, kw, kb = jax.random.split(key, 3)

    B, T, C_in, C_out = 2, 8, 32, 32

    x = jax.random.normal(kx, (B, T, C_in), dtype=jnp.float32)
    # nn.Linear params: weight (C_out, C_in), bias (C_out,)
    weight = jax.random.normal(kw, (C_out, C_in), dtype=jnp.float32) * 0.05
    bias = jax.random.normal(kb, (C_out,), dtype=jnp.float32) * 0.05
    weight_t = weight.T   # pre-transposed once; stays out of the per-call hot path

    y_ref = (x.reshape(-1, C_in) @ weight.T + bias).reshape(B, -1, C_out)

    # Production path: bf16 MXU compute, f32 accumulation + bias, f32 output.
    y = jax.block_until_ready(time_distributed_linear(x, weight_t, bias))
    assert y.shape == (B, T, C_out)
    assert jnp.allclose(y, y_ref, atol=2e-2, rtol=2e-2), "bf16 path mismatch"

    # f32-compute path (test-only; tight numerical check of the kernel itself).
    y_f32 = jax.block_until_ready(
        time_distributed_linear(x, weight_t, bias, compute_dtype=jnp.float32))
    assert y_f32.shape == (B, T, C_out)
    assert jnp.allclose(y_f32, y_ref, atol=1e-5), "f32 path mismatch"

    # Ragged M handled without jnp.pad: M=111 in a single full-dim row tile.
    x2 = jax.random.normal(kx, (3, 37, C_in), dtype=jnp.float32)
    y2 = jax.block_until_ready(time_distributed_linear(x2, weight_t, bias))
    y2_ref = (x2.reshape(-1, C_in) @ weight.T + bias).reshape(3, -1, C_out)
    assert y2.shape == (3, 37, C_out)
    assert jnp.allclose(y2, y2_ref, atol=2e-2, rtol=2e-2), "ragged-M (single-tile) mismatch"

    # Forced multi-tile ragged M (tm=64 over 111 rows -> clipped partial last block).
    y2b = jax.block_until_ready(time_distributed_linear(x2, weight_t, bias, tm=64))
    assert y2b.shape == (3, 37, C_out)
    assert jnp.allclose(y2b, y2_ref, atol=2e-2, rtol=2e-2), "ragged-M (multi-tile) mismatch"

    # bf16 output dtype (halves output HBM traffic when the consumer accepts it).
    y_b16 = jax.block_until_ready(
        time_distributed_linear(x, weight_t, bias, out_dtype=jnp.bfloat16))
    assert y_b16.dtype == jnp.bfloat16
    assert jnp.allclose(y_b16.astype(jnp.float32), y_ref, atol=3e-2, rtol=3e-2)

    # batch_first=False matches the reference module's `view(-1, x_size[0], ...)`.
    x_tbc = jax.random.normal(kx, (T, B, C_in), dtype=jnp.float32)
    y_nb = jax.block_until_ready(
        time_distributed_linear(x_tbc, weight_t, bias, batch_first=False))
    y_nb_ref = (x_tbc.reshape(-1, C_in) @ weight.T + bias).reshape(-1, T, C_out)
    assert y_nb.shape == y_nb_ref.shape
    assert jnp.allclose(y_nb, y_nb_ref, atol=2e-2, rtol=2e-2), "batch_first=False mismatch"

    # 2-D input (len(x_size) <= 2 path: Linear applied directly).
    x_2d = jax.random.normal(kx, (5, C_in), dtype=jnp.float32)
    y_2d = jax.block_until_ready(time_distributed_linear(x_2d, weight_t, bias))
    y_2d_ref = x_2d @ weight.T + bias
    assert y_2d.shape == (5, C_out)
    assert jnp.allclose(y_2d, y_2d_ref, atol=2e-2, rtol=2e-2), "2-D path mismatch"

    print("KERNEL_OK")
</pallas_src>

<mosaic_0001>
module attributes {stable_mosaic.version = 11 : i64} {
  func.func @_linear_kernel(%arg0: i32, %arg1: i32, %arg2: memref<16x32xf32, #tpu.memory_space<vmem>>, %arg3: memref<32x128xbf16, #tpu.memory_space<vmem>>, %arg4: memref<1x128xf32, #tpu.memory_space<vmem>>, %arg5: memref<16x128xf32, #tpu.memory_space<vmem>>) attributes {dimension_semantics = [#tpu.dimension_semantics<parallel>, #tpu.dimension_semantics<parallel>], iteration_bounds = array<i64: 1, 1>, scalar_prefetch = 0 : i64, scratch_operands = 0 : i64, tpu.core_type = #tpu.core_type<tc>, window_params = [{transform_indices = @transform_0, window_bounds = array<i64: 16, 32>}, {pipeline_mode = #tpu.pipeline_mode<synchronous>, transform_indices = @transform_1, window_bounds = array<i64: 32, 128>}, {pipeline_mode = #tpu.pipeline_mode<synchronous>, transform_indices = @transform_2, window_bounds = array<i64: 1, 128>}, {transform_indices = @transform_3, window_bounds = array<i64: 16, 128>}]} {
    %c0 = arith.constant 0 : index
    %c0_0 = arith.constant 0 : index
    %0 = vector.load %arg2[%c0, %c0_0] : memref<16x32xf32, #tpu.memory_space<vmem>>, vector<16x32xf32>
    %1 = arith.truncf %0 : vector<16x32xf32> to vector<16x32xbf16>
    %c0_1 = arith.constant 0 : index
    %c0_2 = arith.constant 0 : index
    %2 = vector.load %arg3[%c0_1, %c0_2] : memref<32x128xbf16, #tpu.memory_space<vmem>>, vector<32x128xbf16>
    %cst = arith.constant dense<0.000000e+00> : vector<16x128xf32>
    %3 = tpu.matmul %1, %2, %cst {dimension_numbers = #tpu.dot_dimension_numbers<[1], [0], [0], [1], [0, 0, 1, 1], [], []>} : vector<16x32xbf16>, vector<32x128xbf16>, vector<16x128xf32> -> vector<16x128xf32>
    %c0_3 = arith.constant 0 : index
    %c0_4 = arith.constant 0 : index
    %4 = vector.load %arg4[%c0_3, %c0_4] : memref<1x128xf32, #tpu.memory_space<vmem>>, vector<1x128xf32>
    %5 = vector.broadcast %4 : vector<1x128xf32> to vector<16x128xf32>
    %6 = arith.addf %3, %5 : vector<16x128xf32>
    %c0_5 = arith.constant 0 : index
    %c0_6 = arith.constant 0 : index
    %7 = vector.load %arg5[%c0_5, %c0_6] : memref<16x128xf32, #tpu.memory_space<vmem>>, vector<16x128xf32>
    tpu.vector_store %arg5[%c0_5, %c0_6], %6 {strides = array<i32>} : memref<16x128xf32, #tpu.memory_space<vmem>>, vector<16x128xf32>,
    return
  }
  func.func @transform_0(%arg0: i32, %arg1: i32) -> (i32, i32) {
    %c0_i32 = arith.constant 0 : i32
    %c0_i32_0 = arith.constant 0 : i32
    return %arg1, %c0_i32 : i32, i32
  }
  func.func @transform_1(%arg0: i32, %arg1: i32) -> (i32, i32) {
    %c0_i32 = arith.constant 0 : i32
    %c0_i32_0 = arith.constant 0 : i32
    return %c0_i32, %arg0 : i32, i32
  }
  func.func @transform_2(%arg0: i32, %arg1: i32) -> (i32, i32) {
    %c0_i32 = arith.constant 0 : i32
    %c0_i32_0 = arith.constant 0 : i32
    return %c0_i32, %arg0 : i32, i32
  }
  func.func @transform_3(%arg0: i32, %arg1: i32) -> (i32, i32) {
    %c0_i32 = arith.constant 0 : i32
    return %arg1, %arg0 : i32, i32
  }
}

module attributes {stable_mosaic.version = 11 : i64} {
  func.func @_linear_kernel(%arg0: i32, %arg1: i32, %arg2: memref<16x32xf32, #tpu.memory_space<vmem>>, %arg3: memref<32x128xbf16, #tpu.memory_space<vmem>>, %arg4: memref<1x128xf32, #tpu.memory_space<vmem>>, %arg5: memref<16x128xf32, #tpu.memory_space<vmem>>) attributes {dimension_semantics = [#tpu.dimension_semantics<parallel>, #tpu.dimension_semantics<parallel>], iteration_bounds = array<i64: 1, 1>, scalar_prefetch = 0 : i64, scratch_operands = 0 : i64, tpu.core_type = #tpu.core_type<tc>, window_params = [{transform_indices = @transform_0, window_bounds = array<i64: 16, 32>}, {transform_indices = @transform_1, window_bounds = array<i64: 32, 128>}, {transform_indices = @transform_2, window_bounds = array<i64: 1, 128>}, {transform_indices = @transform_3, window_bounds = array<i64: 16, 128>}]} {
    %c0 = arith.constant 0 : index
    %c0_0 = arith.constant 0 : index
    %0 = vector.load %arg2[%c0, %c0_0] : memref<16x32xf32, #tpu.memory_space<vmem>>, vector<16x32xf32>
    %1 = arith.truncf %0 : vector<16x32xf32> to vector<16x32xbf16>
    %c0_1 = arith.constant 0 : index
    %c0_2 = arith.constant 0 : index
    %2 = vector.load %arg3[%c0_1, %c0_2] : memref<32x128xbf16, #tpu.memory_space<vmem>>, vector<32x128xbf16>
    %cst = arith.constant dense<0.000000e+00> : vector<16x128xf32>
    %3 = tpu.matmul %1, %2, %cst {dimension_numbers = #tpu.dot_dimension_numbers<[1], [0], [0], [1], [0, 0, 1, 1], [], []>} : vector<16x32xbf16>, vector<32x128xbf16>, vector<16x128xf32> -> vector<16x128xf32>
    %c0_3 = arith.constant 0 : index
    %c0_4 = arith.constant 0 : index
    %4 = vector.load %arg4[%c0_3, %c0_4] : memref<1x128xf32, #tpu.memory_space<vmem>>, vector<1x128xf32>
    %5 = vector.broadcast %4 : vector<1x128xf32> to vector<16x128xf32>
    %6 = arith.addf %3, %5 : vector<16x128xf32>
    %c0_5 = arith.constant 0 : index
    %c0_6 = arith.constant 0 : index
    %7 = vector.load %arg5[%c0_5, %c0_6] : memref<16x128xf32, #tpu.memory_space<vmem>>, vector<16x128xf32>
    tpu.vector_store %arg5[%c0_5, %c0_6], %6 {strides = array<i32>} : memref<16x128xf32, #tpu.memory_space<vmem>>, vector<16x128xf32>,
    return
  }
  func.func @transform_0(%arg0: i32, %arg1: i32) -> (i32, i32) {
    %c0_i32 = arith.constant 0 : i32
    %c0_i32_0 = arith.constant 0 : i32
    return %arg1, %c0_i32 : i32, i32
  }
  func.func @transform_1(%arg0: i32, %arg1: i32) -> (i32, i32) {
    %c0_i32 = arith.constant 0 : i32
    %c0_i32_0 = arith.constant 0 : i32
    return %c0_i32, %arg0 : i32, i32
  }
  func.func @transform_2(%arg0: i32, %arg1: i32) -> (i32, i32) {
    %c0_i32 = arith.constant 0 : i32
    %c0_i32_0 = arith.constant 0 : i32
    return %c0_i32, %arg0 : i32, i32
  }
  func.func @transform_3(%arg0: i32, %arg1: i32) -> (i32, i32) {
    %c0_i32 = arith.constant 0 : i32
    return %arg1, %arg0 : i32, i32
  }
}

</mosaic_0001>

<bundles_post_ra>
// kernel: tpu_custom_call.1
= control target key start
LH: loop header
LB: loop body
LE: loop exit
PB: predicated region body
PF: predicated region fallthrough
CT: control target
= control target key end

     0   :  { %8 = vsyncpa [#allocation3], 0  ;;  %s274_s0 = inlined_call_operand.hbm [shape: f32[16,32], index: 0, kind: input, shape index: {}]   ;;  %s275_s1 = inlined_call_operand.hbm [shape: bf16[32,128], index: 1, kind: input, shape index: {}]   ;;  %s276_s2 = inlined_call_operand.vmem [shape: f32[1,128], index: 2, kind: input, shape index: {}]   ;;  %s277_s3 = inlined_call_operand.hbm [shape: f32[16,128], index: 3, kind: output, shape index: {}]  }
   0x1   :  { %9 = vsyncpa [#allocation6], 0 }
   0x2   :  { %10 = vsyncpa [#allocation4], 0  ;;  %s227_s12 = smov [#allocation2]  }
   0x3   :  { %s16_s13 = sshll.u32 %s227_s12, 4  ;;  %s17_s13 = int_to_ptr.vmem [resolvable:$true] %s16_s13 }
   0x4   :  { %s169_s14 = scalar_lea.vmem %s17_s13, 256  ;;  %p174_p1 = scmp.lt.s32.totalorder %s17_s13, %s17_s13 }
   0x5   :  { %p170_p0 = scmp.ne.s32.totalorder %s17_s13, %s169_s14  ;;  %p175_p2 = scmp.lt.s32.totalorder %s169_s14, %s169_s14 }
   0x7   :  { %p176_p3 = por %p175_p2, %p174_p1 }
   0x9   :  { %p177_p4 = pnand %p176_p3, %p170_p0 }
   0xb   :  { %180 = shalt.err (!%p177_p4)
}
   0xc   :  { %s228_s15 = smov 128   ;;  %s229_s16 = smov 8  }
   0xd   :  { %22 = dma.hbm_to_vmem [thread:$0]  %s274_s0, 256, %s17_s13, [#allocation3], %s228_s15, %s228_s15, %s229_s16  }
   0xe   :  { %s230_s19 = smov [#allocation5]  }
   0xf   :  { %s28_s20 = sshll.u32 %s230_s19, 4  ;;  %s29_s20 = int_to_ptr.vmem [resolvable:$true] %s28_s20 }
  0x10   :  { %s189_s21 = scalar_lea.vmem %s29_s20, 256  ;;  %p194_p6 = scmp.lt.s32.totalorder %s29_s20, %s29_s20 }
  0x11   :  { %p190_p5 = scmp.ne.s32.totalorder %s29_s20, %s189_s21  ;;  %p195_p7 = scmp.lt.s32.totalorder %s189_s21, %s189_s21 }
  0x13   :  { %p196_p8 = por %p195_p7, %p194_p6 }
  0x15   :  { %p197_p9 = pnand %p196_p8, %p190_p5 }
  0x17   :  { %200 = shalt.err (!%p197_p9)
}
  0x18   :  { %s231_s22 = smov 64   ;;  %s232_s23 = smov 4  }
  0x19   :  { %34 = dma.hbm_to_vmem [thread:$0]  %s275_s1, 256, %s29_s20, [#allocation6], %s231_s22, %s231_s22, %s232_s23  }
  0x1a   :  { %221 = dma.done.wait [#allocation3], 256  }
  0x1b   :  { %222 = vsyncadd [#allocation3], 4294967040 }
  0x1c   :  { %223 = dma.done.wait [#allocation6], 256  }
  0x1d   :  { %224 = vsyncadd [#allocation6], 4294967040  ;;  %v233_v0 = vmov 0.0   ;;  %vm234_vm0 = vmmov 0   ;;  %v159_v1 = vld [vmem:[#allocation5 + $0x8] sm:$0xff]   ;;  %v160_v2 = vld [vmem:[#allocation5] sm:$0xff]  }
  0x1e   :  { %142 = vmatprep.subr.bf16.mxu0 %v233_v0  ;;  %146 = vmatprep.mubr.msk.bf16.mxu0 %vm234_vm0, %v233_v0  ;;  %v44_v3 = vld [vmem:[#allocation2] sm:$0xff]  ;;  %v45_v4 = vld [vmem:[#allocation2 + $0x8] sm:$0xff]  ;;  %vm70_vm1 = vcmask 261120   ;;  %s235_s26 = smov [#allocation7]  }
  0x1f   :  { %143 = vmatpush3.bf16.msra.mxu0 %v159_v1  ;;  %v46_v5 = vpack.c.bf16 %v45_v4, %v44_v3  ;;  %v135_v6 = vld [vmem:[%s276_s2] ss:$0 sm:$0xff]  ;;  %s122_s27 = sshll.u32 %s235_s26, 4  ;;  %s123_s27 = int_to_ptr.vmem [resolvable:$true] %s122_s27 }
  0x20   :  { %144 = vmatprep.subr.bf16.mxu0 %v233_v0  ;;  %s201_s28 = scalar_lea.vmem %s123_s27, 256  ;;  %p206_p11 = scmp.lt.s32.totalorder %s123_s27, %s123_s27 }
  0x21   :  { %p202_p10 = scmp.ne.s32.totalorder %s123_s27, %s201_s28  ;;  %p207_p12 = scmp.lt.s32.totalorder %s201_s28, %s201_s28 }
  0x23   :  { %145 = vmatpush3.bf16.msra.mxu0 %v160_v2  ;;  %p208_p13 = por %p207_p12, %p206_p11 }
  0x25   :  { %p209_p0 = pnand %p208_p13, %p202_p10 }
  0x26   :  { %147 = vmatmul.mubr.msk.bf16.vlgmr.msra.gmra.mxu0 %vm70_vm1, %v46_v5 }
  0xe6   :  { %v108_v7 = vpop.f32.mrf.mxu0 }
  0xe7   :  { %v109_v8 = vadd.f32 %v135_v6, %v108_v7 }
  0xe8   :  { %v148_v9 = vpop.f32.mrf.mxu0 }
  0xe9   :  { %115 = vst [vmem:[#allocation7] sm:$0xff] %v109_v8 }
  0xea   :  { %v111_v10 = vpop.f32.mrf.mxu0 }
  0xeb   :  { %v112_v11 = vadd.f32 %v135_v6, %v111_v10 }
  0xec   :  { %v149_v12 = vpop.f32.mrf.mxu0 }
  0xed   :  { %116 = vst [vmem:[#allocation7 + $0x8] sm:$0xff] %v112_v11 }
  0xee   :  { %212 = shalt.err (!%p209_p0)
}
  0xef   :  { %128 = dma.vmem_to_hbm [thread:$0]  %s123_s27, 256, %s277_s3, [#allocation4], %s228_s15, %s228_s15, %s229_s16  }
  0xf0   :  { %225 = dma.done.wait [#allocation4], 256  }
  0xf1   :  { %226 = vsyncadd [#allocation4], 4294967040 }
  0xf2   :  { %132 = vsyncpa [#allocation3], 1 }
  0xf3   :  { %133 = vsyncpa [#allocation6], 1 }
  0xf4   :  { %134 = vsyncpa [#allocation4], 1 }

// kernel: tpu_custom_call.1
= control target key start
LH: loop header
LB: loop body
LE: loop exit
PB: predicated region body
PF: predicated region fallthrough
CT: control target
= control target key end

     0   :  { %8 = vsyncpa [#allocation3], 0  ;;  %s274_s0 = inlined_call_operand.hbm [shape: f32[16,32], index: 0, kind: input, shape index: {}]   ;;  %s275_s1 = inlined_call_operand.hbm [shape: bf16[32,128], index: 1, kind: input, shape index: {}]   ;;  %s276_s2 = inlined_call_operand.vmem [shape: f32[1,128], index: 2, kind: input, shape index: {}]   ;;  %s277_s3 = inlined_call_operand.hbm [shape: f32[16,128], index: 3, kind: output, shape index: {}]  }
   0x1   :  { %9 = vsyncpa [#allocation6], 0 }
   0x2   :  { %10 = vsyncpa [#allocation4], 0  ;;  %s227_s12 = smov [#allocation2]  }
   0x3   :  { %s16_s13 = sshll.u32 %s227_s12, 4  ;;  %s17_s13 = int_to_ptr.vmem [resolvable:$true] %s16_s13 }
   0x4   :  { %s169_s14 = scalar_lea.vmem %s17_s13, 256  ;;  %p174_p1 = scmp.lt.s32.totalorder %s17_s13, %s17_s13 }
   0x5   :  { %p170_p0 = scmp.ne.s32.totalorder %s17_s13, %s169_s14  ;;  %p175_p2 = scmp.lt.s32.totalorder %s169_s14, %s169_s14 }
   0x7   :  { %p176_p3 = por %p175_p2, %p174_p1 }
   0x9   :  { %p177_p4 = pnand %p176_p3, %p170_p0 }
   0xb   :  { %180 = shalt.err (!%p177_p4)
}
   0xc   :  { %s228_s15 = smov 128   ;;  %s229_s16 = smov 8  }
   0xd   :  { %22 = dma.hbm_to_vmem [thread:$0]  %s274_s0, 256, %s17_s13, [#allocation3], %s228_s15, %s228_s15, %s229_s16  }
   0xe   :  { %s230_s19 = smov [#allocation5]  }
   0xf   :  { %s28_s20 = sshll.u32 %s230_s19, 4  ;;  %s29_s20 = int_to_ptr.vmem [resolvable:$true] %s28_s20 }
  0x10   :  { %s189_s21 = scalar_lea.vmem %s29_s20, 256  ;;  %p194_p6 = scmp.lt.s32.totalorder %s29_s20, %s29_s20 }
  0x11   :  { %p190_p5 = scmp.ne.s32.totalorder %s29_s20, %s189_s21  ;;  %p195_p7 = scmp.lt.s32.totalorder %s189_s21, %s189_s21 }
  0x13   :  { %p196_p8 = por %p195_p7, %p194_p6 }
  0x15   :  { %p197_p9 = pnand %p196_p8, %p190_p5 }
  0x17   :  { %200 = shalt.err (!%p197_p9)
}
  0x18   :  { %s231_s22 = smov 64   ;;  %s232_s23 = smov 4  }
  0x19   :  { %34 = dma.hbm_to_vmem [thread:$0]  %s275_s1, 256, %s29_s20, [#allocation6], %s231_s22, %s231_s22, %s232_s23  }
  0x1a   :  { %221 = dma.done.wait [#allocation3], 256  }
  0x1b   :  { %222 = vsyncadd [#allocation3], 4294967040 }
  0x1c   :  { %223 = dma.done.wait [#allocation6], 256  }
  0x1d   :  { %224 = vsyncadd [#allocation6], 4294967040  ;;  %v233_v0 = vmov 0.0   ;;  %vm234_vm0 = vmmov 0   ;;  %v159_v1 = vld [vmem:[#allocation5 + $0x8] sm:$0xff]   ;;  %v160_v2 = vld [vmem:[#allocation5] sm:$0xff]  }
  0x1e   :  { %142 = vmatprep.subr.bf16.mxu0 %v233_v0  ;;  %146 = vmatprep.mubr.msk.bf16.mxu0 %vm234_vm0, %v233_v0  ;;  %v44_v3 = vld [vmem:[#allocation2] sm:$0xff]  ;;  %v45_v4 = vld [vmem:[#allocation2 + $0x8] sm:$0xff]  ;;  %vm70_vm1 = vcmask 261120   ;;  %s235_s26 = smov [#allocation7]  }
  0x1f   :  { %143 = vmatpush3.bf16.msra.mxu0 %v159_v1  ;;  %v46_v5 = vpack.c.bf16 %v45_v4, %v44_v3  ;;  %v135_v6 = vld [vmem:[%s276_s2] ss:$0 sm:$0xff]  ;;  %s122_s27 = sshll.u32 %s235_s26, 4  ;;  %s123_s27 = int_to_ptr.vmem [resolvable:$true] %s122_s27 }
  0x20   :  { %144 = vmatprep.subr.bf16.mxu0 %v233_v0  ;;  %s201_s28 = scalar_lea.vmem %s123_s27, 256  ;;  %p206_p11 = scmp.lt.s32.totalorder %s123_s27, %s123_s27 }
  0x21   :  { %p202_p10 = scmp.ne.s32.totalorder %s123_s27, %s201_s28  ;;  %p207_p12 = scmp.lt.s32.totalorder %s201_s28, %s201_s28 }
  0x23   :  { %145 = vmatpush3.bf16.msra.mxu0 %v160_v2  ;;  %p208_p13 = por %p207_p12, %p206_p11 }
  0x25   :  { %p209_p0 = pnand %p208_p13, %p202_p10 }
  0x26   :  { %147 = vmatmul.mubr.msk.bf16.vlgmr.msra.gmra.mxu0 %vm70_vm1, %v46_v5 }
  0xe6   :  { %v108_v7 = vpop.f32.mrf.mxu0 }
  0xe7   :  { %v109_v8 = vadd.f32 %v135_v6, %v108_v7 }
  0xe8   :  { %v148_v9 = vpop.f32.mrf.mxu0 }
  0xe9   :  { %115 = vst [vmem:[#allocation7] sm:$0xff] %v109_v8 }
  0xea   :  { %v111_v10 = vpop.f32.mrf.mxu0 }
  0xeb   :  { %v112_v11 = vadd.f32 %v135_v6, %v111_v10 }
  0xec   :  { %v149_v12 = vpop.f32.mrf.mxu0 }
  0xed   :  { %116 = vst [vmem:[#allocation7 + $0x8] sm:$0xff] %v112_v11 }
  0xee   :  { %212 = shalt.err (!%p209_p0)
}
  0xef   :  { %128 = dma.vmem_to_hbm [thread:$0]  %s123_s27, 256, %s277_s3, [#allocation4], %s228_s15, %s228_s15, %s229_s16  }
  0xf0   :  { %225 = dma.done.wait [#allocation4], 256  }
  0xf1   :  { %226 = vsyncadd [#allocation4], 4294967040 }
  0xf2   :  { %132 = vsyncpa [#allocation3], 1 }
  0xf3   :  { %133 = vsyncpa [#allocation6], 1 }
  0xf4   :  { %134 = vsyncpa [#allocation4], 1 }

</bundles_post_ra>
